<compile_context>
chip_gen: v7x
topology: tpu7x:2x2x1
jax: 0.10.0
libtpu: 0.0.40
codegen_flags: <defaults>
</compile_context>

<pallas_src>
import functools

import jax
import jax.numpy as jnp
from jax.experimental import pallas as pl
from jax.experimental.pallas import tpu as pltpu


def encoder_layer_kernel(
    x_ref,         # (B_blk, L, E)   f32 activations
    w_in_ref,      # (E, 3E)  bf16   in_proj weight, pre-transposed, Q rows pre-scaled
    b_in_ref,      # (1, 3E)  f32    in_proj bias, Q part pre-scaled
    w_out_ref,     # (E, E)   bf16   out_proj weight, pre-transposed
    b_out_ref,     # (1, E)   f32
    w1_ref,        # (E, F)   bf16   linear1 weight, pre-transposed
    b1_ref,        # (1, F)   f32
    w2_ref,        # (F, E)   bf16   linear2 weight, pre-transposed
    b2_ref,        # (1, E)   f32
    gamma_ref,     # (1, E)   f32    norm2.weight
    beta_ref,      # (1, E)   f32    norm2.bias
    out_ref,       # (B_blk, L, E)   f32
    attn_w_ref,    # (B_blk, L, L)   f32 (head-averaged attention weights)
    attn_acc_ref,  # scratch VMEM (B_blk*L, E) f32 — concat-free head outputs
    *,
    nhead: int,
    head_dim: int,
):
    b_blk, L, E = x_ref.shape
    rows = b_blk * L

    x = x_ref[...].reshape(rows, E).astype(jnp.bfloat16)

    # Fused Q/K/V projection: (rows, E) @ (E, 3E), bf16 inputs / f32 accumulate.
    qkv = jnp.dot(x, w_in_ref[...], preferred_element_type=jnp.float32)
    qkv = (qkv + b_in_ref[...]).reshape(b_blk, L, 3 * E)

    # Per-head attention; batched over B_blk, static unroll over heads.
    avg_w = jnp.zeros((b_blk, L, L), jnp.float32)
    for h in range(nhead):
        lo = h * head_dim
        qh = qkv[:, :, lo:lo + head_dim].astype(jnp.bfloat16)          # scale pre-folded
        kh = qkv[:, :, E + lo:E + lo + head_dim].astype(jnp.bfloat16)
        vh = qkv[:, :, 2 * E + lo:2 * E + lo + head_dim].astype(jnp.bfloat16)

        s = jnp.einsum("bqd,bkd->bqk", qh, kh,
                       preferred_element_type=jnp.float32)             # (B_blk, L, L)
        s = s - jnp.max(s, axis=-1, keepdims=True)
        p = jnp.exp(s)
        p = p * pl.reciprocal(jnp.sum(p, axis=-1, keepdims=True), approx=True)
        avg_w = avg_w + p

        oh = jnp.einsum("bqk,bkd->bqd", p.astype(jnp.bfloat16), vh,
                        preferred_element_type=jnp.float32)            # (B_blk, L, Dh)
        attn_acc_ref[:, lo:lo + head_dim] = oh.reshape(rows, head_dim)

    attn_w_ref[...] = avg_w * jnp.float32(1.0 / nhead)
    # TODO(synk): for large L, emit attn_w through a lane-dense (>=128 wide) layout.

    # Out projection: (rows, E) @ (E, E)
    attn_cat = attn_acc_ref[...].astype(jnp.bfloat16)
    attn_out = jnp.dot(attn_cat, w_out_ref[...],
                       preferred_element_type=jnp.float32) + b_out_ref[...]

    # Feed-forward: linear2(relu(linear1(attn_out)))
    h1 = jnp.dot(attn_out.astype(jnp.bfloat16), w1_ref[...],
                 preferred_element_type=jnp.float32) + b1_ref[...]
    h1 = jnp.maximum(h1, 0.0)
    ffn = jnp.dot(h1.astype(jnp.bfloat16), w2_ref[...],
                  preferred_element_type=jnp.float32) + b2_ref[...]

    # Residual + LayerNorm (norm2), eps matches PyTorch default 1e-5.
    y = ffn + attn_out
    mean = jnp.mean(y, axis=-1, keepdims=True)
    var = jnp.mean(jnp.square(y - mean), axis=-1, keepdims=True)
    y = (y - mean) * jax.lax.rsqrt(var + 1e-5)
    y = y * gamma_ref[...] + beta_ref[...]
    out_ref[...] = y.reshape(b_blk, L, E).astype(out_ref.dtype)


def _choose_batch_block(n: int, l: int) -> int:
    """Aim for >=128 MXU rows (B_blk*L) per program, but keep the parallel grid
    at >=2 programs when the batch allows it (megacore / dual-TC v7x)."""
    b = max(1, 128 // max(l, 1))
    b = min(b, n)
    if n >= 2:
        b = min(b, pl.cdiv(n, 2))
    return max(b, 1)


def transformer_encoder_layer(x_nle, params, *, nhead):
    """One AttentionTransformerEncoderLayer. x_nle: (N, L, E) f32."""
    N, L, E = x_nle.shape
    F_dim = params["w1_t"].shape[1]
    assert E % nhead == 0
    head_dim = E // nhead

    b_blk = _choose_batch_block(N, L)
    n_pad = pl.cdiv(N, b_blk) * b_blk
    if n_pad != N:
        x_nle = jnp.pad(x_nle, ((0, n_pad - N), (0, 0), (0, 0)))
    grid = (n_pad // b_blk,)

    def rep_spec(shape):
        nd = len(shape)
        return pl.BlockSpec(shape, lambda b, _nd=nd: (0,) * _nd)

    kernel = functools.partial(encoder_layer_kernel, nhead=nhead, head_dim=head_dim)

    out, attn_w = pl.pallas_call(
        kernel,
        grid=grid,
        in_specs=[
            pl.BlockSpec((b_blk, L, E), lambda b: (b, 0, 0)),
            rep_spec((E, 3 * E)),
            rep_spec((1, 3 * E)),
            rep_spec((E, E)),
            rep_spec((1, E)),
            rep_spec((E, F_dim)),
            rep_spec((1, F_dim)),
            rep_spec((F_dim, E)),
            rep_spec((1, E)),
            rep_spec((1, E)),
            rep_spec((1, E)),
        ],
        out_specs=[
            pl.BlockSpec((b_blk, L, E), lambda b: (b, 0, 0)),
            pl.BlockSpec((b_blk, L, L), lambda b: (b, 0, 0)),
        ],
        out_shape=[
            jax.ShapeDtypeStruct((n_pad, L, E), jnp.float32),
            jax.ShapeDtypeStruct((n_pad, L, L), jnp.float32),
        ],
        scratch_shapes=[pltpu.VMEM((b_blk * L, E), jnp.float32)],
        compiler_params=pltpu.CompilerParams(dimension_semantics=("parallel",)),
        # NOTE: constant weights are double-buffered by default; for large E/F on
        # v7x (64 MiB VMEM) consider pipeline_mode=pl.Buffered(1) on the weight
        # specs and/or raising vmem_limit_bytes.
    )(
        x_nle,
        params["w_in_t"], params["b_in"],
        params["w_out_t"], params["b_out"],
        params["w1_t"], params["b1"],
        params["w2_t"], params["b2"],
        params["gamma"], params["beta"],
    )
    return out[:N], attn_w[:N]


def visit_transformer_forward(src_lne, layer_params_list, *, nhead):
    """src_lne: (L, N, E), like the PyTorch module.
    Returns ((L, N, E), [(N, L, L)] * num_layers)."""
    x = jnp.transpose(src_lne, (1, 0, 2))  # (N, L, E); kept across all layers
    attn_weights_list = []
    for params in layer_params_list:
        x, attn_w = transformer_encoder_layer(x, params, nhead=nhead)
        attn_weights_list.append(attn_w)
    return jnp.transpose(x, (1, 0, 2)), attn_weights_list


def init_layer_params(key, model_dim, dim_feedforward):
    """PyTorch-layout raw parameters (in_proj_weight (3E,E), linearX.weight (out,in))."""
    E, F_dim = model_dim, dim_feedforward
    ks = jax.random.split(key, 8)
    s = 0.02
    return dict(
        w_in=jax.random.normal(ks[0], (3 * E, E), jnp.float32) * s,
        b_in=jax.random.normal(ks[1], (1, 3 * E), jnp.float32) * s,
        w_out=jax.random.normal(ks[2], (E, E), jnp.float32) * s,
        b_out=jax.random.normal(ks[3], (1, E), jnp.float32) * s,
        w1=jax.random.normal(ks[4], (F_dim, E), jnp.float32) * s,
        b1=jax.random.normal(ks[5], (1, F_dim), jnp.float32) * s,
        w2=jax.random.normal(ks[6], (E, F_dim), jnp.float32) * s,
        b2=jax.random.normal(ks[7], (1, E), jnp.float32) * s,
        gamma=jnp.ones((1, E), jnp.float32),
        beta=jnp.zeros((1, E), jnp.float32),
    )


def prepare_layer_params(raw, nhead):
    """One-time offline prep: fold 1/sqrt(head_dim) into Q rows of the in-proj,
    pre-transpose all weights for the kernel's (rows, in) @ (in, out) matmuls,
    and cast weights to bf16 (biases / LN params stay f32)."""
    E = raw["w_out"].shape[0]
    head_dim = E // nhead
    scale = 1.0 / float(head_dim) ** 0.5
    w_in = raw["w_in"].at[:E, :].multiply(scale)       # scale Q rows
    b_in = raw["b_in"].at[:, :E].multiply(scale)       # scale Q bias
    return dict(
        w_in_t=w_in.T.astype(jnp.bfloat16),            # (E, 3E)
        b_in=b_in.astype(jnp.float32),
        w_out_t=raw["w_out"].T.astype(jnp.bfloat16),   # (E, E)
        b_out=raw["b_out"].astype(jnp.float32),
        w1_t=raw["w1"].T.astype(jnp.bfloat16),         # (E, F)
        b1=raw["b1"].astype(jnp.float32),
        w2_t=raw["w2"].T.astype(jnp.bfloat16),         # (F, E)
        b2=raw["b2"].astype(jnp.float32),
        gamma=raw["gamma"].astype(jnp.float32),
        beta=raw["beta"].astype(jnp.float32),
    )


if __name__ == "__main__":
    # Small, module-consistent shapes.
    seq_len, batch, model_dim = 8, 2, 32
    nhead, num_layers, dim_feedforward = 4, 2, 64

    key = jax.random.PRNGKey(0)
    k_src, k_params = jax.random.split(key)

    src = jax.random.normal(k_src, (seq_len, batch, model_dim), jnp.float32)  # (L, N, E)

    layer_keys = jax.random.split(k_params, num_layers)
    layer_params_list = [
        prepare_layer_params(
            init_layer_params(layer_keys[i], model_dim, dim_feedforward), nhead
        )
        for i in range(num_layers)
    ]

    output, attn_weights_list = visit_transformer_forward(
        src, layer_params_list, nhead=nhead
    )
    output = jax.block_until_ready(output)
    attn_weights_list = [jax.block_until_ready(a) for a in attn_weights_list]

    assert output.shape == (seq_len, batch, model_dim)
    assert len(attn_weights_list) == num_layers
    assert all(a.shape == (batch, seq_len, seq_len) for a in attn_weights_list)
    assert bool(jnp.all(jnp.isfinite(output)))

    print("KERNEL_OK")
</pallas_src>

<mosaic_0001>
module attributes {stable_mosaic.version = 11 : i64} {
  func.func @encoder_layer_kernel(%arg0: i32, %arg1: memref<1x8x32xf32, #tpu.memory_space<vmem>>, %arg2: memref<32x96xbf16, #tpu.memory_space<vmem>>, %arg3: memref<1x96xf32, #tpu.memory_space<vmem>>, %arg4: memref<32x32xbf16, #tpu.memory_space<vmem>>, %arg5: memref<1x32xf32, #tpu.memory_space<vmem>>, %arg6: memref<32x64xbf16, #tpu.memory_space<vmem>>, %arg7: memref<1x64xf32, #tpu.memory_space<vmem>>, %arg8: memref<64x32xbf16, #tpu.memory_space<vmem>>, %arg9: memref<1x32xf32, #tpu.memory_space<vmem>>, %arg10: memref<1x32xf32, #tpu.memory_space<vmem>>, %arg11: memref<1x32xf32, #tpu.memory_space<vmem>>, %arg12: memref<1x8x32xf32, #tpu.memory_space<vmem>>, %arg13: memref<1x8x8xf32, #tpu.memory_space<vmem>>, %arg14: memref<8x32xf32, #tpu.memory_space<vmem>>) attributes {dimension_semantics = [#tpu.dimension_semantics<parallel>], iteration_bounds = array<i64: 2>, scalar_prefetch = 0 : i64, scratch_operands = 1 : i64, tpu.core_type = #tpu.core_type<tc>, window_params = [{transform_indices = @transform_0, window_bounds = array<i64: 1, 8, 32>}, {pipeline_mode = #tpu.pipeline_mode<synchronous>, transform_indices = @transform_1, window_bounds = array<i64: 32, 96>}, {pipeline_mode = #tpu.pipeline_mode<synchronous>, transform_indices = @transform_2, window_bounds = array<i64: 1, 96>}, {pipeline_mode = #tpu.pipeline_mode<synchronous>, transform_indices = @transform_3, window_bounds = array<i64: 32, 32>}, {pipeline_mode = #tpu.pipeline_mode<synchronous>, transform_indices = @transform_4, window_bounds = array<i64: 1, 32>}, {pipeline_mode = #tpu.pipeline_mode<synchronous>, transform_indices = @transform_5, window_bounds = array<i64: 32, 64>}, {pipeline_mode = #tpu.pipeline_mode<synchronous>, transform_indices = @transform_6, window_bounds = array<i64: 1, 64>}, {pipeline_mode = #tpu.pipeline_mode<synchronous>, transform_indices = @transform_7, window_bounds = array<i64: 64, 32>}, {pipeline_mode = #tpu.pipeline_mode<synchronous>, transform_indices = @transform_8, window_bounds = array<i64: 1, 32>}, {pipeline_mode = #tpu.pipeline_mode<synchronous>, transform_indices = @transform_9, window_bounds = array<i64: 1, 32>}, {pipeline_mode = #tpu.pipeline_mode<synchronous>, transform_indices = @transform_10, window_bounds = array<i64: 1, 32>}, {transform_indices = @transform_11, window_bounds = array<i64: 1, 8, 32>}, {transform_indices = @transform_12, window_bounds = array<i64: 1, 8, 8>}]} {
    %c0 = arith.constant 0 : index
    %c0_0 = arith.constant 0 : index
    %c0_1 = arith.constant 0 : index
    %0 = vector.load %arg1[%c0, %c0_0, %c0_1] : memref<1x8x32xf32, #tpu.memory_space<vmem>>, vector<1x8x32xf32>
    %1 = vector.shape_cast %0 : vector<1x8x32xf32> to vector<8x32xf32>
    %2 = arith.truncf %1 : vector<8x32xf32> to vector<8x32xbf16>
    %c0_2 = arith.constant 0 : index
    %c0_3 = arith.constant 0 : index
    %3 = vector.load %arg2[%c0_2, %c0_3] : memref<32x96xbf16, #tpu.memory_space<vmem>>, vector<32x96xbf16>
    %cst = arith.constant dense<0.000000e+00> : vector<8x96xf32>
    %4 = tpu.matmul %2, %3, %cst {dimension_numbers = #tpu.dot_dimension_numbers<[1], [0], [0], [1], [0, 0, 1, 1], [], []>} : vector<8x32xbf16>, vector<32x96xbf16>, vector<8x96xf32> -> vector<8x96xf32>
    %c0_4 = arith.constant 0 : index
    %c0_5 = arith.constant 0 : index
    %5 = vector.load %arg3[%c0_4, %c0_5] : memref<1x96xf32, #tpu.memory_space<vmem>>, vector<1x96xf32>
    %6 = vector.broadcast %5 : vector<1x96xf32> to vector<8x96xf32>
    %7 = arith.addf %4, %6 : vector<8x96xf32>
    %8 = vector.shape_cast %7 : vector<8x96xf32> to vector<1x8x96xf32>
    %cst_6 = arith.constant 0.000000e+00 : f32
    %9 = vector.broadcast %cst_6 : f32 to vector<1x8x8xf32>
    %10 = vector.extract_strided_slice %8 {offsets = [0, 0, 0], sizes = [1, 8, 8], strides = [1, 1, 1]} : vector<1x8x96xf32> to vector<1x8x8xf32>
    %11 = arith.truncf %10 : vector<1x8x8xf32> to vector<1x8x8xbf16>
    %12 = vector.extract_strided_slice %8 {offsets = [0, 0, 32], sizes = [1, 8, 8], strides = [1, 1, 1]} : vector<1x8x96xf32> to vector<1x8x8xf32>
    %13 = arith.truncf %12 : vector<1x8x8xf32> to vector<1x8x8xbf16>
    %14 = vector.extract_strided_slice %8 {offsets = [0, 0, 64], sizes = [1, 8, 8], strides = [1, 1, 1]} : vector<1x8x96xf32> to vector<1x8x8xf32>
    %15 = arith.truncf %14 : vector<1x8x8xf32> to vector<1x8x8xbf16>
    "tpu.trace_start"() <{level = 10 : i32, message = "bqd,bkd->bqk"}> : () -> ()
    %cst_7 = arith.constant dense<0.000000e+00> : vector<1x8x8xf32>
    %16 = tpu.matmul %11, %13, %cst_7 {dimension_numbers = #tpu.dot_dimension_numbers<[2], [2], [1], [1], [0, 0, 0, 1, 1, 1], [0], [0]>} : vector<1x8x8xbf16>, vector<1x8x8xbf16>, vector<1x8x8xf32> -> vector<1x8x8xf32>
    "tpu.trace_stop"() : () -> ()
    %cst_8 = arith.constant dense<0xFF800000> : vector<1x8xf32>
    %17 = vector.multi_reduction <maximumf>, %16, %cst_8 [2] : vector<1x8x8xf32> to vector<1x8xf32>
    %18 = vector.shape_cast %17 : vector<1x8xf32> to vector<1x8x1xf32>
    %19 = vector.broadcast %18 : vector<1x8x1xf32> to vector<1x8x8xf32>
    %20 = arith.subf %16, %19 : vector<1x8x8xf32>
    %21 = math.exp %20 : vector<1x8x8xf32>
    %cst_9 = arith.constant dense<0.000000e+00> : vector<1x8xf32>
    %22 = vector.multi_reduction <add>, %21, %cst_9 [2] : vector<1x8x8xf32> to vector<1x8xf32>
    %23 = vector.shape_cast %22 : vector<1x8xf32> to vector<1x8x1xf32>
    %24 = tpu.reciprocal %23 {approx = true} : vector<1x8x1xf32> -> vector<1x8x1xf32>
    %25 = vector.broadcast %24 : vector<1x8x1xf32> to vector<1x8x8xf32>
    %26 = arith.mulf %21, %25 : vector<1x8x8xf32>
    %27 = arith.addf %9, %26 : vector<1x8x8xf32>
    %28 = arith.truncf %26 : vector<1x8x8xf32> to vector<1x8x8xbf16>
    "tpu.trace_start"() <{level = 10 : i32, message = "bqk,bkd->bqd"}> : () -> ()
    %cst_10 = arith.constant dense<0.000000e+00> : vector<1x8x8xf32>
    %29 = tpu.matmul %28, %15, %cst_10 {dimension_numbers = #tpu.dot_dimension_numbers<[2], [1], [1], [2], [0, 0, 0, 1, 1, 2], [0], [0]>} : vector<1x8x8xbf16>, vector<1x8x8xbf16>, vector<1x8x8xf32> -> vector<1x8x8xf32>
    "tpu.trace_stop"() : () -> ()
    %30 = vector.shape_cast %29 : vector<1x8x8xf32> to vector<8x8xf32>
    %c0_11 = arith.constant 0 : index
    %c0_12 = arith.constant 0 : index
    %31 = vector.load %arg14[%c0_11, %c0_12] : memref<8x32xf32, #tpu.memory_space<vmem>>, vector<8x8xf32>
    tpu.vector_store %arg14[%c0_11, %c0_12], %30 {strides = array<i32>} : memref<8x32xf32, #tpu.memory_space<vmem>>, vector<8x8xf32>,
    %32 = vector.extract_strided_slice %8 {offsets = [0, 0, 8], sizes = [1, 8, 8], strides = [1, 1, 1]} : vector<1x8x96xf32> to vector<1x8x8xf32>
    %33 = arith.truncf %32 : vector<1x8x8xf32> to vector<1x8x8xbf16>
    %34 = vector.extract_strided_slice %8 {offsets = [0, 0, 40], sizes = [1, 8, 8], strides = [1, 1, 1]} : vector<1x8x96xf32> to vector<1x8x8xf32>
    %35 = arith.truncf %34 : vector<1x8x8xf32> to vector<1x8x8xbf16>
    %36 = vector.extract_strided_slice %8 {offsets = [0, 0, 72], sizes = [1, 8, 8], strides = [1, 1, 1]} : vector<1x8x96xf32> to vector<1x8x8xf32>
    %37 = arith.truncf %36 : vector<1x8x8xf32> to vector<1x8x8xbf16>
    "tpu.trace_start"() <{level = 10 : i32, message = "bqd,bkd->bqk"}> : () -> ()
    %cst_13 = arith.constant dense<0.000000e+00> : vector<1x8x8xf32>
    %38 = tpu.matmul %33, %35, %cst_13 {dimension_numbers = #tpu.dot_dimension_numbers<[2], [2], [1], [1], [0, 0, 0, 1, 1, 1], [0], [0]>} : vector<1x8x8xbf16>, vector<1x8x8xbf16>, vector<1x8x8xf32> -> vector<1x8x8xf32>
    "tpu.trace_stop"() : () -> ()
    %cst_14 = arith.constant dense<0xFF800000> : vector<1x8xf32>
    %39 = vector.multi_reduction <maximumf>, %38, %cst_14 [2] : vector<1x8x8xf32> to vector<1x8xf32>
    %40 = vector.shape_cast %39 : vector<1x8xf32> to vector<1x8x1xf32>
    %41 = vector.broadcast %40 : vector<1x8x1xf32> to vector<1x8x8xf32>
    %42 = arith.subf %38, %41 : vector<1x8x8xf32>
    %43 = math.exp %42 : vector<1x8x8xf32>
    %cst_15 = arith.constant dense<0.000000e+00> : vector<1x8xf32>
    %44 = vector.multi_reduction <add>, %43, %cst_15 [2] : vector<1x8x8xf32> to vector<1x8xf32>
    %45 = vector.shape_cast %44 : vector<1x8xf32> to vector<1x8x1xf32>
    %46 = tpu.reciprocal %45 {approx = true} : vector<1x8x1xf32> -> vector<1x8x1xf32>
    %47 = vector.broadcast %46 : vector<1x8x1xf32> to vector<1x8x8xf32>
    %48 = arith.mulf %43, %47 : vector<1x8x8xf32>
    %49 = arith.addf %27, %48 : vector<1x8x8xf32>
    %50 = arith.truncf %48 : vector<1x8x8xf32> to vector<1x8x8xbf16>
    "tpu.trace_start"() <{level = 10 : i32, message = "bqk,bkd->bqd"}> : () -> ()
    %cst_16 = arith.constant dense<0.000000e+00> : vector<1x8x8xf32>
    %51 = tpu.matmul %50, %37, %cst_16 {dimension_numbers = #tpu.dot_dimension_numbers<[2], [1], [1], [2], [0, 0, 0, 1, 1, 2], [0], [0]>} : vector<1x8x8xbf16>, vector<1x8x8xbf16>, vector<1x8x8xf32> -> vector<1x8x8xf32>
    "tpu.trace_stop"() : () -> ()
    %52 = vector.shape_cast %51 : vector<1x8x8xf32> to vector<8x8xf32>
    %c0_17 = arith.constant 0 : index
    %c8 = arith.constant 8 : index
    %53 = vector.load %arg14[%c0_17, %c8] : memref<8x32xf32, #tpu.memory_space<vmem>>, vector<8x8xf32>
    tpu.vector_store %arg14[%c0_17, %c8], %52 {strides = array<i32>} : memref<8x32xf32, #tpu.memory_space<vmem>>, vector<8x8xf32>,
    %54 = vector.extract_strided_slice %8 {offsets = [0, 0, 16], sizes = [1, 8, 8], strides = [1, 1, 1]} : vector<1x8x96xf32> to vector<1x8x8xf32>
    %55 = arith.truncf %54 : vector<1x8x8xf32> to vector<1x8x8xbf16>
    %56 = vector.extract_strided_slice %8 {offsets = [0, 0, 48], sizes = [1, 8, 8], strides = [1, 1, 1]} : vector<1x8x96xf32> to vector<1x8x8xf32>
    %57 = arith.truncf %56 : vector<1x8x8xf32> to vector<1x8x8xbf16>
    %58 = vector.extract_strided_slice %8 {offsets = [0, 0, 80], sizes = [1, 8, 8], strides = [1, 1, 1]} : vector<1x8x96xf32> to vector<1x8x8xf32>
    %59 = arith.truncf %58 : vector<1x8x8xf32> to vector<1x8x8xbf16>
    "tpu.trace_start"() <{level = 10 : i32, message = "bqd,bkd->bqk"}> : () -> ()
    %cst_18 = arith.constant dense<0.000000e+00> : vector<1x8x8xf32>
    %60 = tpu.matmul %55, %57, %cst_18 {dimension_numbers = #tpu.dot_dimension_numbers<[2], [2], [1], [1], [0, 0, 0, 1, 1, 1], [0], [0]>} : vector<1x8x8xbf16>, vector<1x8x8xbf16>, vector<1x8x8xf32> -> vector<1x8x8xf32>
    "tpu.trace_stop"() : () -> ()
    %cst_19 = arith.constant dense<0xFF800000> : vector<1x8xf32>
    %61 = vector.multi_reduction <maximumf>, %60, %cst_19 [2] : vector<1x8x8xf32> to vector<1x8xf32>
    %62 = vector.shape_cast %61 : vector<1x8xf32> to vector<1x8x1xf32>
    %63 = vector.broadcast %62 : vector<1x8x1xf32> to vector<1x8x8xf32>
    %64 = arith.subf %60, %63 : vector<1x8x8xf32>
    %65 = math.exp %64 : vector<1x8x8xf32>
    %cst_20 = arith.constant dense<0.000000e+00> : vector<1x8xf32>
    %66 = vector.multi_reduction <add>, %65, %cst_20 [2] : vector<1x8x8xf32> to vector<1x8xf32>
    %67 = vector.shape_cast %66 : vector<1x8xf32> to vector<1x8x1xf32>
    %68 = tpu.reciprocal %67 {approx = true} : vector<1x8x1xf32> -> vector<1x8x1xf32>
    %69 = vector.broadcast %68 : vector<1x8x1xf32> to vector<1x8x8xf32>
    %70 = arith.mulf %65, %69 : vector<1x8x8xf32>
    %71 = arith.addf %49, %70 : vector<1x8x8xf32>
    %72 = arith.truncf %70 : vector<1x8x8xf32> to vector<1x8x8xbf16>
    "tpu.trace_start"() <{level = 10 : i32, message = "bqk,bkd->bqd"}> : () -> ()
    %cst_21 = arith.constant dense<0.000000e+00> : vector<1x8x8xf32>
    %73 = tpu.matmul %72, %59, %cst_21 {dimension_numbers = #tpu.dot_dimension_numbers<[2], [1], [1], [2], [0, 0, 0, 1, 1, 2], [0], [0]>} : vector<1x8x8xbf16>, vector<1x8x8xbf16>, vector<1x8x8xf32> -> vector<1x8x8xf32>
    "tpu.trace_stop"() : () -> ()
    %74 = vector.shape_cast %73 : vector<1x8x8xf32> to vector<8x8xf32>
    %c0_22 = arith.constant 0 : index
    %c16 = arith.constant 16 : index
    %75 = vector.load %arg14[%c0_22, %c16] : memref<8x32xf32, #tpu.memory_space<vmem>>, vector<8x8xf32>
    tpu.vector_store %arg14[%c0_22, %c16], %74 {strides = array<i32>} : memref<8x32xf32, #tpu.memory_space<vmem>>, vector<8x8xf32>,
    %76 = vector.extract_strided_slice %8 {offsets = [0, 0, 24], sizes = [1, 8, 8], strides = [1, 1, 1]} : vector<1x8x96xf32> to vector<1x8x8xf32>
    %77 = arith.truncf %76 : vector<1x8x8xf32> to vector<1x8x8xbf16>
    %78 = vector.extract_strided_slice %8 {offsets = [0, 0, 56], sizes = [1, 8, 8], strides = [1, 1, 1]} : vector<1x8x96xf32> to vector<1x8x8xf32>
    %79 = arith.truncf %78 : vector<1x8x8xf32> to vector<1x8x8xbf16>
    %80 = vector.extract_strided_slice %8 {offsets = [0, 0, 88], sizes = [1, 8, 8], strides = [1, 1, 1]} : vector<1x8x96xf32> to vector<1x8x8xf32>
    %81 = arith.truncf %80 : vector<1x8x8xf32> to vector<1x8x8xbf16>
    "tpu.trace_start"() <{level = 10 : i32, message = "bqd,bkd->bqk"}> : () -> ()
    %cst_23 = arith.constant dense<0.000000e+00> : vector<1x8x8xf32>
    %82 = tpu.matmul %77, %79, %cst_23 {dimension_numbers = #tpu.dot_dimension_numbers<[2], [2], [1], [1], [0, 0, 0, 1, 1, 1], [0], [0]>} : vector<1x8x8xbf16>, vector<1x8x8xbf16>, vector<1x8x8xf32> -> vector<1x8x8xf32>
    "tpu.trace_stop"() : () -> ()
    %cst_24 = arith.constant dense<0xFF800000> : vector<1x8xf32>
    %83 = vector.multi_reduction <maximumf>, %82, %cst_24 [2] : vector<1x8x8xf32> to vector<1x8xf32>
    %84 = vector.shape_cast %83 : vector<1x8xf32> to vector<1x8x1xf32>
    %85 = vector.broadcast %84 : vector<1x8x1xf32> to vector<1x8x8xf32>
    %86 = arith.subf %82, %85 : vector<1x8x8xf32>
    %87 = math.exp %86 : vector<1x8x8xf32>
    %cst_25 = arith.constant dense<0.000000e+00> : vector<1x8xf32>
    %88 = vector.multi_reduction <add>, %87, %cst_25 [2] : vector<1x8x8xf32> to vector<1x8xf32>
    %89 = vector.shape_cast %88 : vector<1x8xf32> to vector<1x8x1xf32>
    %90 = tpu.reciprocal %89 {approx = true} : vector<1x8x1xf32> -> vector<1x8x1xf32>
    %91 = vector.broadcast %90 : vector<1x8x1xf32> to vector<1x8x8xf32>
    %92 = arith.mulf %87, %91 : vector<1x8x8xf32>
    %93 = arith.addf %71, %92 : vector<1x8x8xf32>
    %94 = arith.truncf %92 : vector<1x8x8xf32> to vector<1x8x8xbf16>
    "tpu.trace_start"() <{level = 10 : i32, message = "bqk,bkd->bqd"}> : () -> ()
    %cst_26 = arith.constant dense<0.000000e+00> : vector<1x8x8xf32>
    %95 = tpu.matmul %94, %81, %cst_26 {dimension_numbers = #tpu.dot_dimension_numbers<[2], [1], [1], [2], [0, 0, 0, 1, 1, 2], [0], [0]>} : vector<1x8x8xbf16>, vector<1x8x8xbf16>, vector<1x8x8xf32> -> vector<1x8x8xf32>
    "tpu.trace_stop"() : () -> ()
    %96 = vector.shape_cast %95 : vector<1x8x8xf32> to vector<8x8xf32>
    %c0_27 = arith.constant 0 : index
    %c24 = arith.constant 24 : index
    %97 = vector.load %arg14[%c0_27, %c24] : memref<8x32xf32, #tpu.memory_space<vmem>>, vector<8x8xf32>
    tpu.vector_store %arg14[%c0_27, %c24], %96 {strides = array<i32>} : memref<8x32xf32, #tpu.memory_space<vmem>>, vector<8x8xf32>,
    %cst_28 = arith.constant 2.500000e-01 : f32
    %98 = vector.broadcast %cst_28 : f32 to vector<1x8x8xf32>
    %99 = arith.mulf %93, %98 : vector<1x8x8xf32>
    %c0_29 = arith.constant 0 : index
    %c0_30 = arith.constant 0 : index
    %c0_31 = arith.constant 0 : index
    %100 = vector.load %arg13[%c0_29, %c0_30, %c0_31] : memref<1x8x8xf32, #tpu.memory_space<vmem>>, vector<1x8x8xf32>
    tpu.vector_store %arg13[%c0_29, %c0_30, %c0_31], %99 {strides = array<i32>} : memref<1x8x8xf32, #tpu.memory_space<vmem>>, vector<1x8x8xf32>,
    %c0_32 = arith.constant 0 : index
    %c0_33 = arith.constant 0 : index
    %101 = vector.load %arg14[%c0_32, %c0_33] : memref<8x32xf32, #tpu.memory_space<vmem>>, vector<8x32xf32>
    %102 = arith.truncf %101 : vector<8x32xf32> to vector<8x32xbf16>
    %c0_34 = arith.constant 0 : index
    %c0_35 = arith.constant 0 : index
    %103 = vector.load %arg4[%c0_34, %c0_35] : memref<32x32xbf16, #tpu.memory_space<vmem>>, vector<32x32xbf16>
    %cst_36 = arith.constant dense<0.000000e+00> : vector<8x32xf32>
    %104 = tpu.matmul %102, %103, %cst_36 {dimension_numbers = #tpu.dot_dimension_numbers<[1], [0], [0], [1], [0, 0, 1, 1], [], []>} : vector<8x32xbf16>, vector<32x32xbf16>, vector<8x32xf32> -> vector<8x32xf32>
    %c0_37 = arith.constant 0 : index
    %c0_38 = arith.constant 0 : index
    %105 = vector.load %arg5[%c0_37, %c0_38] : memref<1x32xf32, #tpu.memory_space<vmem>>, vector<1x32xf32>
    %106 = vector.broadcast %105 : vector<1x32xf32> to vector<8x32xf32>
    %107 = arith.addf %104, %106 : vector<8x32xf32>
    %108 = arith.truncf %107 : vector<8x32xf32> to vector<8x32xbf16>
    %c0_39 = arith.constant 0 : index
    %c0_40 = arith.constant 0 : index
    %109 = vector.load %arg6[%c0_39, %c0_40] : memref<32x64xbf16, #tpu.memory_space<vmem>>, vector<32x64xbf16>
    %cst_41 = arith.constant dense<0.000000e+00> : vector<8x64xf32>
    %110 = tpu.matmul %108, %109, %cst_41 {dimension_numbers = #tpu.dot_dimension_numbers<[1], [0], [0], [1], [0, 0, 1, 1], [], []>} : vector<8x32xbf16>, vector<32x64xbf16>, vector<8x64xf32> -> vector<8x64xf32>
    %c0_42 = arith.constant 0 : index
    %c0_43 = arith.constant 0 : index
    %111 = vector.load %arg7[%c0_42, %c0_43] : memref<1x64xf32, #tpu.memory_space<vmem>>, vector<1x64xf32>
    %112 = vector.broadcast %111 : vector<1x64xf32> to vector<8x64xf32>
    %113 = arith.addf %110, %112 : vector<8x64xf32>
    %cst_44 = arith.constant 0.000000e+00 : f32
    %114 = vector.broadcast %cst_44 : f32 to vector<8x64xf32>
    %115 = arith.maximumf %113, %114 : vector<8x64xf32>
    %116 = arith.truncf %115 : vector<8x64xf32> to vector<8x64xbf16>
    %c0_45 = arith.constant 0 : index
    %c0_46 = arith.constant 0 : index
    %117 = vector.load %arg8[%c0_45, %c0_46] : memref<64x32xbf16, #tpu.memory_space<vmem>>, vector<64x32xbf16>
    %cst_47 = arith.constant dense<0.000000e+00> : vector<8x32xf32>
    %118 = tpu.matmul %116, %117, %cst_47 {dimension_numbers = #tpu.dot_dimension_numbers<[1], [0], [0], [1], [0, 0, 1, 1], [], []>} : vector<8x64xbf16>, vector<64x32xbf16>, vector<8x32xf32> -> vector<8x32xf32>
    %c0_48 = arith.constant 0 : index
    %c0_49 = arith.constant 0 : index
    %119 = vector.load %arg9[%c0_48, %c0_49] : memref<1x32xf32, #tpu.memory_space<vmem>>, vector<1x32xf32>
    %120 = vector.broadcast %119 : vector<1x32xf32> to vector<8x32xf32>
    %121 = arith.addf %118, %120 : vector<8x32xf32>
    %122 = arith.addf %121, %107 : vector<8x32xf32>
    %cst_50 = arith.constant dense<0.000000e+00> : vector<8xf32>
    %123 = vector.multi_reduction <add>, %122, %cst_50 [1] : vector<8x32xf32> to vector<8xf32>
    %124 = vector.shape_cast %123 : vector<8xf32> to vector<8x1xf32>
    %cst_51 = arith.constant 3.200000e+01 : f32
    %125 = vector.broadcast %cst_51 : f32 to vector<8x1xf32>
    %126 = arith.divf %124, %125 : vector<8x1xf32>
    %127 = vector.broadcast %126 : vector<8x1xf32> to vector<8x32xf32>
    %128 = arith.subf %122, %127 : vector<8x32xf32>
    %129 = arith.mulf %128, %128 : vector<8x32xf32>
    %cst_52 = arith.constant dense<0.000000e+00> : vector<8xf32>
    %130 = vector.multi_reduction <add>, %129, %cst_52 [1] : vector<8x32xf32> to vector<8xf32>
    %131 = vector.shape_cast %130 : vector<8xf32> to vector<8x1xf32>
    %cst_53 = arith.constant 3.200000e+01 : f32
    %132 = vector.broadcast %cst_53 : f32 to vector<8x1xf32>
    %133 = arith.divf %131, %132 : vector<8x1xf32>
    %134 = vector.broadcast %126 : vector<8x1xf32> to vector<8x32xf32>
    %135 = arith.subf %122, %134 : vector<8x32xf32>
    %cst_54 = arith.constant 9.99999974E-6 : f32
    %136 = vector.broadcast %cst_54 : f32 to vector<8x1xf32>
    %137 = arith.addf %133, %136 : vector<8x1xf32>
    %138 = math.rsqrt %137 : vector<8x1xf32>
    %139 = vector.broadcast %138 : vector<8x1xf32> to vector<8x32xf32>
    %140 = arith.mulf %135, %139 : vector<8x32xf32>
    %c0_55 = arith.constant 0 : index
    %c0_56 = arith.constant 0 : index
    %141 = vector.load %arg10[%c0_55, %c0_56] : memref<1x32xf32, #tpu.memory_space<vmem>>, vector<1x32xf32>
    %142 = vector.broadcast %141 : vector<1x32xf32> to vector<8x32xf32>
    %143 = arith.mulf %140, %142 : vector<8x32xf32>
    %c0_57 = arith.constant 0 : index
    %c0_58 = arith.constant 0 : index
    %144 = vector.load %arg11[%c0_57, %c0_58] : memref<1x32xf32, #tpu.memory_space<vmem>>, vector<1x32xf32>
    %145 = vector.broadcast %144 : vector<1x32xf32> to vector<8x32xf32>
    %146 = arith.addf %143, %145 : vector<8x32xf32>
    %147 = vector.shape_cast %146 : vector<8x32xf32> to vector<1x8x32xf32>
    %c0_59 = arith.constant 0 : index
    %c0_60 = arith.constant 0 : index
    %c0_61 = arith.constant 0 : index
    %148 = vector.load %arg12[%c0_59, %c0_60, %c0_61] : memref<1x8x32xf32, #tpu.memory_space<vmem>>, vector<1x8x32xf32>
    tpu.vector_store %arg12[%c0_59, %c0_60, %c0_61], %147 {strides = array<i32>} : memref<1x8x32xf32, #tpu.memory_space<vmem>>, vector<1x8x32xf32>,
    return
  }
  func.func @transform_0(%arg0: i32) -> (i32, i32, i32) {
    %c0_i32 = arith.constant 0 : i32
    %c0_i32_0 = arith.constant 0 : i32
    %c0_i32_1 = arith.constant 0 : i32
    return %arg0, %c0_i32, %c0_i32_0 : i32, i32, i32
  }
  func.func @transform_1(%arg0: i32) -> (i32, i32) {
    %c0_i32 = arith.constant 0 : i32
    %c0_i32_0 = arith.constant 0 : i32
    %c0_i32_1 = arith.constant 0 : i32
    return %c0_i32, %c0_i32_0 : i32, i32
  }
  func.func @transform_2(%arg0: i32) -> (i32, i32) {
    %c0_i32 = arith.constant 0 : i32
    %c0_i32_0 = arith.constant 0 : i32
    %c0_i32_1 = arith.constant 0 : i32
    return %c0_i32, %c0_i32_0 : i32, i32
  }
  func.func @transform_3(%arg0: i32) -> (i32, i32) {
    %c0_i32 = arith.constant 0 : i32
    %c0_i32_0 = arith.constant 0 : i32
    %c0_i32_1 = arith.constant 0 : i32
    return %c0_i32, %c0_i32_0 : i32, i32
  }
  func.func @transform_4(%arg0: i32) -> (i32, i32) {
    %c0_i32 = arith.constant 0 : i32
    %c0_i32_0 = arith.constant 0 : i32
    %c0_i32_1 = arith.constant 0 : i32
    return %c0_i32, %c0_i32_0 : i32, i32
  }
  func.func @transform_5(%arg0: i32) -> (i32, i32) {
    %c0_i32 = arith.constant 0 : i32
    %c0_i32_0 = arith.constant 0 : i32
    %c0_i32_1 = arith.constant 0 : i32
    return %c0_i32, %c0_i32_0 : i32, i32
  }
  func.func @transform_6(%arg0: i32) -> (i32, i32) {
    %c0_i32 = arith.constant 0 : i32
    %c0_i32_0 = arith.constant 0 : i32
    %c0_i32_1 = arith.constant 0 : i32
    return %c0_i32, %c0_i32_0 : i32, i32
  }
  func.func @transform_7(%arg0: i32) -> (i32, i32) {
    %c0_i32 = arith.constant 0 : i32
    %c0_i32_0 = arith.constant 0 : i32
    %c0_i32_1 = arith.constant 0 : i32
    return %c0_i32, %c0_i32_0 : i32, i32
  }
  func.func @transform_8(%arg0: i32) -> (i32, i32) {
    %c0_i32 = arith.constant 0 : i32
    %c0_i32_0 = arith.constant 0 : i32
    %c0_i32_1 = arith.constant 0 : i32
    return %c0_i32, %c0_i32_0 : i32, i32
  }
  func.func @transform_9(%arg0: i32) -> (i32, i32) {
    %c0_i32 = arith.constant 0 : i32
    %c0_i32_0 = arith.constant 0 : i32
    %c0_i32_1 = arith.constant 0 : i32
    return %c0_i32, %c0_i32_0 : i32, i32
  }
  func.func @transform_10(%arg0: i32) -> (i32, i32) {
    %c0_i32 = arith.constant 0 : i32
    %c0_i32_0 = arith.constant 0 : i32
    %c0_i32_1 = arith.constant 0 : i32
    return %c0_i32, %c0_i32_0 : i32, i32
  }
  func.func @transform_11(%arg0: i32) -> (i32, i32, i32) {
    %c0_i32 = arith.constant 0 : i32
    %c0_i32_0 = arith.constant 0 : i32
    %c0_i32_1 = arith.constant 0 : i32
    return %arg0, %c0_i32, %c0_i32_0 : i32, i32, i32
  }
  func.func @transform_12(%arg0: i32) -> (i32, i32, i32) {
    %c0_i32 = arith.constant 0 : i32
    %c0_i32_0 = arith.constant 0 : i32
    %c0_i32_1 = arith.constant 0 : i32
    return %arg0, %c0_i32, %c0_i32_0 : i32, i32, i32
  }
}

</mosaic_0001>

<bundles_post_ra>
// kernel: tpu_custom_call.1
= control target key start
LH: loop header
LB: loop body
LE: loop exit
PB: predicated region body
PF: predicated region fallthrough
CT: control target
= control target key end

     0   :  { %s2135_s0 = inlined_call_operand.vmem [shape: f32[2,8,32], index: 0, kind: input, shape index: {}]   ;;  %s2136_s1 = inlined_call_operand.vmem [shape: bf16[32,96], index: 1, kind: input, shape index: {}]   ;;  %s2137_s2 = inlined_call_operand.vmem [shape: f32[1,96], index: 2, kind: input, shape index: {}]   ;;  %s2138_s3 = inlined_call_operand.vmem [shape: bf16[32,32], index: 3, kind: input, shape index: {}]   ;;  %s2139_s4 = inlined_call_operand.vmem [shape: f32[1,32], index: 4, kind: input, shape index: {}]   ;;  %s2140_s5 = inlined_call_operand.hbm [shape: bf16[32,64], index: 5, kind: input, shape index: {}]   ;;  %s2141_s6 = inlined_call_operand.vmem [shape: f32[1,64], index: 6, kind: input, shape index: {}]   ;;  %s2142_s7 = inlined_call_operand.vmem [shape: bf16[64,32], index: 7, kind: input, shape index: {}]   ;;  %s2143_s8 = inlined_call_operand.vmem [shape: f32[1,32], index: 8, kind: input, shape index: {}]   ;;  %s2144_s9 = inlined_call_operand.vmem [shape: f32[1,32], index: 9, kind: input, shape index: {}]   ;;  %s2145_s10 = inlined_call_operand.vmem [shape: f32[1,32], index: 10, kind: input, shape index: {}]   ;;  %s2146_s11 = inlined_call_operand.hbm [shape: f32[2,8,32], index: 11, kind: output, shape index: {0}]   ;;  %s2147_s12 = inlined_call_operand.hbm [shape: f32[2,8,8], index: 12, kind: output, shape index: {1}]  }
   0x1   :  { %2154 = sst [smem:[#allocation14_spill]] %s2135_s0 }
   0x2   :  { %18 = vsyncpa [#allocation4], 0 }
   0x3   :  { %19 = vsyncpa [#allocation5], 0 }
   0x4   :  { %21 = vsyncpa [#allocation5 + $0x1], 0 }
   0x5   :  { %22 = vsyncpa [#allocation8], 0 }
   0x6   :  { %24 = vsyncpa [#allocation8 + $0x1], 0  ;;  %s1831_s21 = smov 0   ;;  %s1833_s22 = smov 0  }
   0x7   :  { %s1835_s23 = smov 0   ;;  %s1837_s24 = smov 0  }
   0x8 LB: > { %2155 = sst [smem:[#allocation12_spill]] %s1739_s23  ;;  %s1852_s25 = sadd.s32 4294967295, %s1743_s24   ;;  %s1743_s24 = sphi %s1837_s24, %s2173_s24   ;;  %s1739_s23 = sphi %s1835_s23, %s2170_s23   ;;  %s1735_s22 = sphi %s1833_s22, %s2172_s22   ;;  %s1731_s21 = sphi %s1831_s21, %s2171_s21  }
   0x9   : > { %s1359_s26 = sadd.s32 4294967294, %s1743_s24   ;;  %s1856_s27 = sadd.s32 1, %s1743_s24  }
   0xa   : > { %s273_s28 = sadd.s32 1, %s1739_s23  ;;  %s270_s29 = ssub.s32 %s1743_s24, %s1856_s27 }
   0xb   : > { %p283_p0 = scmp.ne.s32.totalorder %s1739_s23, %s1735_s22  ;;  %p271_p1 = scmp.eq.s32.totalorder %s270_s29, 0 }
   0xc   : > { %p284_p2 = scmp.eq.s32.totalorder %s1852_s25, 1  ;;  %p289_p3 = scmp.ne.s32.totalorder %s1735_s22, %s1731_s21 }
   0xd   : > { %p290_p4 = scmp.eq.s32.totalorder %s1359_s26, 1  ;;  %p1360_p7 = scmp.ge.s32.totalorder %s1743_s24, 1 }
   0xe   : > { %s1867_s30 = scalar_select %p271_p1, %s1739_s23, %s273_s28  }
   0xf   : > { %p1869_p5 = por %p284_p2, %p283_p0  ;;  %p1873_p6 = por %p290_p4, %p289_p3 }
  0x10   : > { %2156 = sst [smem:[#allocation13_spill]] %s1867_s30  ;;  %p323_p8 = scmp.lt.s32.totalorder %s1743_s24, 3 }
  0x11   : > { %s2157_s13 = scalar_select %p1869_p5, 1, 0 }
  0x12   : > { %s2158_s14 = scalar_select %p1873_p6, 1, 0 }
  0x13   : > { %p2149_p9 = scmp.eq.s32.totalorder %s1852_s25, 0  ;;  %p1880_p10 = pnand %p1360_p7, %p323_p8 }
  0x14   : > { %s1745_s16 = smov [#allocation3]   ;;  %s1617_s26 = scalar_lea.hbm %s2140_s5, 256 }
  0x15   : > { %s2159_s15 = scalar_select %p1880_p10, 1, 0 }
  0x16   : > { %s347_s17 = sshll.u32 %s1745_s16, 4  ;;  %p1524_p11 = pneg %p1880_p10  ;;  %s348_s17 = int_to_ptr.vmem [resolvable:$true] %s347_s17 }
  0x17   : > { %p1618_p13 = scmp.ne.s32.totalorder %s2140_s5, %s1617_s26  ;;  %p1624_p3 = scmp.lt.u32.totalorder %s1617_s26, %s2140_s5 }
  0x18   : > { %p1888_p12 = pnand %p2149_p9, %p1524_p11 }
  0x1a   : > { %p1619_p0 = pneg %p1888_p12 }
  0x1c   : > { %p1620_p1 = pnand %p1619_p0, %p1618_p13 }
  0x1e   : > { %p1621_p2 = pneg %p1620_p1 }
  0x20   : > { %p1626_p4 = pnand %p1624_p3, %p1621_p2 }
  0x22   : > { %1629 = shalt.err (!%p1626_p4)
}
  0x23   : > { %s1630_s23 = scalar_lea.vmem %s348_s17, 256  ;;  %p1638_p9 = scmp.lt.s32.totalorder %s348_s17, %s348_s17 }
  0x24   : > { %p1631_p7 = scmp.ne.s32.totalorder %s348_s17, %s1630_s23  ;;  %p1639_p6 = scmp.lt.s32.totalorder %s1630_s23, %s1630_s23 }
  0x26   : > { %p1633_p8 = pnand %p1631_p7, %p1619_p0  ;;  %p1640_p5 = por %p1639_p6, %p1638_p9 }
  0x28   : > { %p1634_p11 = pneg %p1633_p8 }
  0x2a   : > { %p1641_p10 = pnand %p1640_p5, %p1634_p11 }
  0x2c   : > { %1644 = shalt.err (!%p1641_p10)
}
  0x2d   : > { %s1746_s19 = smov 64   ;;  %s1747_s20 = smov 4  }
  0x2e   : > { %1527 = dma.hbm_to_vmem [thread:$0]  (!%p1888_p12), %s2140_s5, 256, %s348_s17, [#allocation4], %s1746_s19, %s1746_s19, %s1747_s20  }
  0x2f   : > { %p2161_p13 = scmp.ne.s32.totalorder %s2159_s15, 0 }
  0x30   : > { %p2162_p1 = scmp.eq.s32.totalorder (!%p2161_p13), %s1852_s25, 0 }
  0x31   : > { %385 = sbr.rel (%p2161_p13) target bundleno = 2310 (0x906), region = 64 }
  0x38   : > { %1718 = dma.done.wait (%p2162_p1), [#allocation4], 256   ;;  %p2163_p0 = pmov %p2162_p1 }
  0x39   : > { %p431_p5 = scmp.lt.s32.totalorder %s1852_s25, 1  ;;  %v1748_v0 = vmov 0.0   ;;  %vm1749_vm0 = vmmov 0   ;;  %s2164_s0 = sld [smem:[#allocation14_spill]]  ;;  %v1589_v1 = vld [vmem:[%s2136_s1] sm:$0xff]   ;;  %v1590_v2 = vld [vmem:[%s2136_s1 + $0x8] sm:$0xff]  }
  0x3a   : > { %1720 = vsyncadd (%p2163_p0), [#allocation4], 4294967040  ;;  %1432 = vmatprep.subr.bf16.mxu0 %v1748_v0  ;;  %1436 = vmatprep.mubr.msk.bf16.mxu0 %vm1749_vm0, %v1748_v0  ;;  %vm461_vm1 = vcmask 261120   ;;  %v1368_v5 = vld [vmem:[%s2137_s2] ss:$0 sm:$0xff]  ;;  %s1752_s15 = smov 80  }
  0x3b   : > { %s432_s23 = scalar_select %p431_p5, %s1852_s25, 1  ;;  %1440 = vmatprep.subr.bf16.mxu1 %v1748_v0  ;;  %1442 = vmatprep.mubr.msk.bf16.mxu1 %vm1749_vm0, %v1748_v0  ;;  %vm509_vm2 = vcmask 64512   ;;  %vm574_vm3 = vcmask 1043456   ;;  %vm734_vm4 = vcmask 130112   ;;  %vm851_vm5 = vcmask 195712  }
  0x3c   : > { %1433 = vmatpush3.bf16.msra.mxu0 %v1589_v1  ;;  %s1753_s17 = smov 88   ;;  %s1755_s26 = smov 112   ;;  %vm968_vm6 = vcmask 261312   ;;  %vm1148_vm7 = vcmask 523264  }
  0x3d   : > { %s1367_s30 = sshll.u32 %s432_s23, 3  ;;  %1434 = vmatprep.subr.bf16.mxu0 %v1748_v0  ;;  %s1750_s23 = smov 120  }
  0x3e   : > { %s1756_s16 = smov 104   ;;  %s1757_s19 = smov 56  }
  0x3f   : > { %s434_s18 = scalar_lea.vmem %s2164_s0, %s1367_s30  ;;  %s1751_s30 = smov 96  }
  0x40   : > { %v436_v3 = vld [vmem:[%s434_s18] sm:$0xff]  ;;  %1435 = vmatpush3.bf16.msra.mxu0 %v1590_v2  ;;  %s1754_s18 = smov 72   ;;  %s1758_s20 = smov 64  }
  0x41   : > { %v437_v4 = vpack.c.bf16 %v436_v3, %v436_v3  ;;  %1446 = vmatprep.subr.bf16.mxu0 %v1748_v0  ;;  %s1759_s28 = smov 40   ;;  %s1760_s29 = smov 48  }
  0x42   : > { %p2165_p9 = scmp.ne.s32.totalorder %s2157_s13, 0 }
  0x43   : > { %1437 = vmatmul.mubr.msk.bf16.vlgmr.msra.gmra.mrb[0].mxu0 %vm461_vm1, %v437_v4 }
  0x44   : > { %1448 = vmatprep.mubr.msk.bf16.mxu0 %vm1749_vm0, %v1748_v0 }
 0x116   : > { %v499_v6 = vpop.f32.mrb[0].mxu0 }
 0x117   : > { %v500_v7 = vadd.f32 %v1368_v5, %v499_v6  ;;  %v1438_v8 = vpop.f32.mrb[1].mxu0 }
 0x118   : > { %v502_v9 = vpop.f32.mrb[2].mxu0 }
 0x119   : > { %v1939_v10 = vpack.c.bf16 %v500_v7, %v500_v7  ;;  %v1439_v11 = vpop.f32.mrb[3].mxu0 }
 0x11b   : > { %619 = vrot.lane.b32.xlu1 %v1939_v10, %s1750_s23  ;;  %507 = vrot.lane.b32.xlu0 %v1939_v10, %s1751_s30  ;;  %s1996_s23 = sand.u32 1, %s1735_s22  }
 0x11c   : > { %s2152_s30 = sshll.u32 %s1996_s23, 3 }
 0x11f   : > { %738 = vrot.lane.b32.xlu1 %v1939_v10, %s1752_s15  ;;  %621 = vrot.lane.b32.xlu0 %v1939_v10, %s1753_s17  ;;  %s2007_s15 = scalar_lea.vmem [#allocation7], %s2152_s30  ;;  %s1761_s17 = smov 8  }
 0x123   : > { %855 = vrot.lane.b32.xlu1 %v1939_v10, %s1754_s18  ;;  %736 = vrot.lane.b32.xlu0 %v1939_v10, %s1755_s26  ;;  %s1256_s18 = sshll.u32 %s2007_s15, 4  ;;  %s1230_s26 = scalar_lea.sflag [#allocation8], %s1996_s23  ;;  %s1257_s18 = int_to_ptr.vmem [resolvable:$true] %s1256_s18 }
 0x127   : > { %853 = vrot.lane.b32.xlu0 %v1939_v10, %s1756_s16  ;;  %s1645_s16 = scalar_lea.vmem %s1257_s18, 128 }
 0x128   : > { %p1646_p6 = scmp.ne.s32.totalorder %s1257_s18, %s1645_s16 }
 0x12a   : > { %p1647_p10 = pnand %p1646_p6, %p2165_p9 }
 0x12c   : > { %p1648_p12 = pneg %p1647_p10 }
 0x18d   : > { %v508_v12 = vpop.permute.xlu0 %507  ;;  %v620_v15 = vpop.permute.xlu1 %619 }
 0x18e   : > { %v514_v13 = vsel %vm509_vm2, %v508_v12, 0 }
 0x18f   : > { %1441 = vmatpush3.bf16.xpose.msra.mxu1 %v514_v13 }
 0x190   : > { %1452 = vmatprep.subr.bf16.mxu1 %v1748_v0 }
 0x191   : > { %v622_v14 = vpop.permute.xlu0 %621  ;;  %v739_v17 = vpop.permute.xlu1 %738 }
 0x192   : > { %v627_v16 = vsel %vm509_vm2, %v622_v14, 0  ;;  %v744_v18 = vsel %vm509_vm2, %v739_v17, 0 }
 0x195   : > { %v856_v19 = vpop.permute.xlu1 %855  ;;  %v737_v20 = vpop.permute.xlu0 %736 }
 0x196   : > { %1443 = vmatmul.mubr.msk.bf16.vlgmr.msra.gmra.mrb[0].mxu1 %vm509_vm2, %v1939_v10  ;;  %v861_v21 = vsel %vm509_vm2, %v856_v19, 0 }
 0x197   : > { %1453 = vmatpush3.bf16.xpose.msra.mxu1 %v627_v16  ;;  %1454 = vmatprep.mubr.msk.bf16.mxu1 %vm1749_vm0, %v1748_v0 }
 0x198   : > { %1464 = vmatprep.subr.bf16.mxu1 %v1748_v0 }
 0x199   : > { %v854_v22 = vpop.permute.xlu0 %853 }
 0x19e   : > { %1455 = vmatmul.mubr.msk.bf16.vlgmr.msra.gmra.mrb[4].mxu1 %vm509_vm2, %v620_v15 }
 0x19f   : > { %1465 = vmatpush3.bf16.xpose.msra.mxu1 %v744_v18  ;;  %1466 = vmatprep.mubr.msk.bf16.mxu1 %vm1749_vm0, %v1748_v0 }
 0x1a0   : > { %1476 = vmatprep.subr.bf16.mxu1 %v1748_v0 }
 0x1a6   : > { %1467 = vmatmul.mubr.msk.bf16.vlgmr.msra.gmra.mrb[8].mxu1 %vm509_vm2, %v737_v20 }
 0x1a7   : > { %1477 = vmatpush3.bf16.xpose.msra.mxu1 %v861_v21  ;;  %1478 = vmatprep.mubr.msk.bf16.mxu1 %vm1749_vm0, %v1748_v0 }
 0x1a8   : > { %1488 = vmatprep.subr.bf16.mxu1 %v1748_v0 }
 0x1ae   : > { %1479 = vmatmul.mubr.msk.bf16.vlgmr.msra.gmra.mrb[12].mxu1 %vm509_vm2, %v854_v22 }
 0x1af   : > { %1492 = vmatprep.mubr.msk.bf16.mxu1 %vm1749_vm0, %v1748_v0 }
 0x269   : > { %v550_v23 = vpop.f32.mrb[0].mxu1 }
 0x26a   : > { %v1444_v24 = vpop.f32.mrb[1].mxu1  ;;  %v556_v25 = vsel %vm509_vm2, %v550_v23, -inf }
 0x26b   : > { %557 = vmax.xlane.f32.xlu1 %v556_v25  ;;  %v553_v26 = vpop.f32.mrb[2].mxu1 }
 0x26c   : > { %v1445_v27 = vpop.f32.mrb[3].mxu1 }
 0x271   : > { %v663_v28 = vpop.f32.mrb[4].mxu1 }
 0x272   : > { %v1456_v29 = vpop.f32.mrb[5].mxu1  ;;  %v669_v30 = vsel %vm509_vm2, %v663_v28, -inf }
 0x273   : > { %670 = vmax.xlane.f32.xlu0 %v669_v30  ;;  %v666_v31 = vpop.f32.mrb[6].mxu1 }
 0x274   : > { %v1457_v32 = vpop.f32.mrb[7].mxu1 }
 0x279   : > { %v780_v33 = vpop.f32.mrb[8].mxu1 }
 0x27a   : > { %v1468_v34 = vpop.f32.mrb[9].mxu1  ;;  %v786_v35 = vsel %vm509_vm2, %v780_v33, -inf }
 0x27b   : > { %787 = vmax.xlane.f32.xlu0 %v786_v35  ;;  %v783_v36 = vpop.f32.mrb[10].mxu1 }
 0x27c   : > { %v1469_v37 = vpop.f32.mrb[11].mxu1  ;;  %v1591_v36 = vld [vmem:[%s2138_s3] sm:$0xff]  }
 0x27d   : > { %1489 = vmatpush3.bf16.msra.mxu1 %v1591_v36  ;;  %v1592_v37 = vld [vmem:[%s2138_s3 + $0x8] sm:$0xff]  }
 0x27e   : > { %1490 = vmatprep.subr.bf16.mxu1 %v1748_v0 }
 0x281   : > { %v897_v38 = vpop.f32.mrb[12].mxu1  ;;  %1491 = vmatpush3.bf16.msra.mxu1 %v1592_v37 }
 0x282   : > { %v1480_v39 = vpop.f32.mrb[13].mxu1  ;;  %v903_v40 = vsel %vm509_vm2, %v897_v38, -inf  ;;  %1504 = vmatprep.subr.bf16.mxu1 %v1748_v0 }
 0x283   : > { %904 = vmax.xlane.f32.xlu1 %v903_v40  ;;  %v900_v41 = vpop.f32.mrb[14].mxu1 }
 0x284   : > { %v1481_v42 = vpop.f32.mrb[15].mxu1 }
 0x285   : > { %v1593_v42 = vld [vmem:[#allocation3] sm:$0xff]  }
 0x2f8   : > { %v558_v43 = vpop.xlane.xlu1 %557 }
 0x2f9   : > { %v559_v44 = vsub.f32 %v550_v23, %v558_v43 }
 0x2fb   : > { %v560_v45 = vmul.f32 1.442695, %v559_v44 }
 0x2fd   : > { %1599 = vpow2.f32 %v560_v45 }
 0x300   : > { %v671_v46 = vpop.xlane.xlu0 %670 }
 0x301   : > { %v672_v47 = vsub.f32 %v663_v28, %v671_v46 }
 0x303   : > { %v673_v48 = vmul.f32 1.442695, %v672_v47 }
 0x305   : > { %1601 = vpow2.f32 %v673_v48 }
 0x307   : > { %v1600_v49 = vpop.eup %1599 }
 0x308   : > { %v788_v50 = vpop.xlane.xlu0 %787  ;;  %v562_v51 = vsel %vm509_vm2, %v1600_v49, 0.0 }
 0x309   : > { %v789_v52 = vsub.f32 %v780_v33, %v788_v50  ;;  %563 = vadd.xlane.f32.xlu0 %v562_v51 }
 0x30b   : > { %v790_v53 = vmul.f32 1.442695, %v789_v52  ;;  %v1594_v52 = vld [vmem:[#allocation3 + $0x8] sm:$0xff]  }
 0x30d   : > { %1603 = vpow2.f32 %v790_v53  ;;  %v1595_v53 = vld [vmem:[%s2142_s7] sm:$0xff]  }
 0x30f   : > { %v1602_v54 = vpop.eup %1601 }
 0x310   : > { %v675_v55 = vsel %vm509_vm2, %v1602_v54, 0.0  ;;  %v905_v58 = vpop.xlane.xlu1 %904 }
 0x311   : > { %676 = vadd.xlane.f32.xlu1 %v675_v55  ;;  %v906_v59 = vsub.f32 %v897_v38, %v905_v58  ;;  %v1380_v55 = vld [vmem:[%s2139_s4] ss:$0 sm:$0xff] }
 0x313   : > { %v907_v60 = vmul.f32 1.442695, %v906_v59 }
 0x315   : > { %1605 = vpow2.f32 %v907_v60 }
 0x317   : > { %v1604_v56 = vpop.eup %1603 }
 0x318   : > { %v792_v57 = vsel %vm509_vm2, %v1604_v56, 0.0 }
 0x319   : > { %793 = vadd.xlane.f32.xlu0 %v792_v57 }
 0x31f   : > { %v1606_v61 = vpop.eup %1605 }
 0x320   : > { %v909_v62 = vsel %vm509_vm2, %v1606_v61, 0.0 }
 0x322   : > { %682 = vrot.lane.b32.xlu1 %v1939_v10, %s1757_s19  ;;  %s1764_s19 = smov [#allocation7]  }
 0x323   : > { %s1649_s30 = sshll.u32 %s1764_s19, 4  ;;  %s1650_s30 = int_to_ptr.vmem [resolvable:$false] %s1649_s30 }
 0x324   : > { %s1651_s0 = scalar_lea.vmem %s1650_s30, 256  ;;  %p1652_p2 = scmp.lt.s32.totalorder %s1257_s18, %s1650_s30 }
 0x325   : > { %p1653_p3 = scmp.lt.s32.totalorder %s1651_s0, %s1645_s16 }
 0x327   : > { %p1654_p4 = por %p1653_p3, %p1652_p2 }
 0x329   : > { %p1655_p7 = pnand %p1654_p4, %p1648_p12 }
 0x32f   : > { %569 = vrot.lane.b32.xlu0 %v1939_v10, %s1758_s20  ;;  %s1762_s20 = smov 16  }
 0x333   : > { %916 = vrot.lane.b32.xlu0 %v1939_v10, %s1759_s28  ;;  %s1763_s28 = smov 24  }
 0x346   : > { %910 = vadd.xlane.f32.xlu1 %v909_v62  ;;  %v1597_v62 = vld [vmem:[%s2142_s7 + $0x10] sm:$0xff]  }
 0x357   : > { %799 = vrot.lane.b32.xlu1 %v1939_v10, %s1760_s29 }
 0x396   : > { %v564_v63 = vpop.xlane.xlu0 %563 }
 0x397   : > { %1607 = vrcp.f32 %v564_v63  ;;  %v1598_v63 = vld [vmem:[%s2142_s7 + $0x18] sm:$0xff]  }
 0x39e   : > { %v677_v1 = vpop.xlane.xlu1 %676 }
 0x39f   : > { %1609 = vrcp.f32 %v677_v1  ;;  %v1384_v1 = vld [vmem:[%s2141_s6] ss:$0 sm:$0xff] }
 0x3a1   : > { %v1608_v2 = vpop.eup %1607 }
 0x3a2   : > { %v566_v4 = vmul.f32 %v1608_v2, %v1600_v49  ;;  %v683_v7 = vpop.permute.xlu1 %682 }
 0x3a3   : > { %v688_v11 = vsel %vm574_vm3, %v683_v7, 0 }
 0x3a4   : > { %v568_v8 = vpack.c.bf16 %v566_v4, %v566_v4 }
 0x3a6   : > { %v794_v3 = vpop.xlane.xlu0 %793 }
 0x3a7   : > { %1611 = vrcp.f32 %v794_v3 }
 0x3a9   : > { %v1610_v9 = vpop.eup %1609 }
 0x3aa   : > { %v570_v5 = vpop.permute.xlu0 %569  ;;  %v679_v10 = vmul.f32 %v1610_v9, %v1602_v54  ;;  %v1596_v54 = vld [vmem:[%s2142_s7 + $0x8] sm:$0xff]  }
 0x3ab   : > { %v576_v6 = vsel %vm574_vm3, %v570_v5, 0 }
 0x3ac   : > { %1447 = vmatpush3.bf16.msra.mxu0 %v576_v6  ;;  %v681_v12 = vpack.c.bf16 %v679_v10, %v679_v10  ;;  %v680_v21 = vadd.f32 %v679_v10, %v566_v4 }
 0x3ad   : > { %1458 = vmatprep.subr.bf16.mxu0 %v1748_v0 }
 0x3ae   : > { %v917_v18 = vpop.permute.xlu0 %916 }
 0x3af   : > { %1449 = vmatmul.mubr.msk.bf16.vlgmr.msra.gmra.mrb[4].mxu0 %vm509_vm2, %v568_v8  ;;  %v922_v20 = vsel %vm574_vm3, %v917_v18, 0 }
 0x3b0   : > { %1459 = vmatpush3.bf16.msra.mxu0 %v688_v11  ;;  %1460 = vmatprep.mubr.msk.bf16.mxu0 %vm1749_vm0, %v1748_v0 }
 0x3b1   : > { %1470 = vmatprep.subr.bf16.mxu0 %v1748_v0  ;;  %v1612_v13 = vpop.eup %1611 }
 0x3b2   : > { %v796_v15 = vmul.f32 %v1612_v13, %v1604_v56 }
 0x3b4   : > { %v798_v19 = vpack.c.bf16 %v796_v15, %v796_v15  ;;  %v797_v23 = vadd.f32 %v796_v15, %v680_v21 }
 0x3b7   : > { %1461 = vmatmul.mubr.msk.bf16.vlgmr.msra.gmra.mrb[8].mxu0 %vm509_vm2, %v681_v12 }
 0x3b8   : > { %1472 = vmatprep.mubr.msk.bf16.mxu0 %vm1749_vm0, %v1748_v0 }
 0x3d3   : > { %v911_v14 = vpop.xlane.xlu1 %910 }
 0x3d4   : > { %1613 = vrcp.f32 %v911_v14 }
 0x3d7   : > { %v800_v16 = vpop.permute.xlu1 %799 }
 0x3d8   : > { %v805_v17 = vsel %vm574_vm3, %v800_v16, 0 }
 0x3d9   : > { %1471 = vmatpush3.bf16.msra.mxu0 %v805_v17 }
 0x3da   : > { %1482 = vmatprep.subr.bf16.mxu0 %v1748_v0 }
 0x3dc   : > { %1473 = vmatmul.mubr.msk.bf16.vlgmr.msra.gmra.mrb[12].mxu0 %vm509_vm2, %v798_v19 }
 0x3dd   : > { %1483 = vmatpush3.bf16.msra.mxu0 %v922_v20  ;;  %1484 = vmatprep.mubr.msk.bf16.mxu0 %vm1749_vm0, %v1748_v0 }
 0x3de   : > { %v1614_v22 = vpop.eup %1613  ;;  %1496 = vmatprep.subr.bf16.mxu0 %v1748_v0 }
 0x3df   : > { %v913_v24 = vmul.f32 %v1614_v22, %v1606_v61 }
 0x3e1   : > { %v914_v25 = vadd.f32 %v913_v24, %v797_v23  ;;  %v915_v26 = vpack.c.bf16 %v913_v24, %v913_v24 }
 0x3e3   : > { %v970_v27 = vmul.f32 0.25, %v914_v25 }
 0x3e4   : > { %1485 = vmatmul.mubr.msk.bf16.vlgmr.msra.gmra.mrb[16].mxu0 %vm509_vm2, %v915_v26 }
 0x3e5   : > { %1500 = vmatprep.mubr.msk.bf16.mxu0 %vm1749_vm0, %v1748_v0  ;;  %971 = vst.msk [vmem:[%s2007_s15] sm:$0xff] %vm509_vm2, %v970_v27  ;;  %1497 = vmatpush3.bf16.msra.mxu0 %v1593_v42 }
 0x3e6   : > { %1498 = vmatprep.subr.bf16.mxu0 %v1748_v0 }
 0x3e9   : > { %1499 = vmatpush3.bf16.msra.mxu0 %v1594_v52 }
 0x482   : > { %v612_v28 = vpop.f32.mrb[4].mxu0 }
 0x483   : > { %618 = vst.msk [vmem:[#allocation2] sm:$0xff] %vm509_vm2, %v612_v28  ;;  %v1450_v29 = vpop.f32.mrb[5].mxu0 }
 0x484   : > { %v615_v30 = vpop.f32.mrb[6].mxu0 }
 0x485   : > { %v1451_v31 = vpop.f32.mrb[7].mxu0 }
 0x48a   : > { %v724_v32 = vpop.f32.mrb[8].mxu0 }
 0x48b   : > { %731 = vrot.lane.b32.xlu1 %v724_v32, %s1761_s17  ;;  %v1462_v33 = vpop.f32.mrb[9].mxu0 }
 0x48c   : > { %v727_v34 = vpop.f32.mrb[10].mxu0 }
 0x48d   : > { %v1463_v35 = vpop.f32.mrb[11].mxu0 }
 0x4af   : > { %v841_v38 = vpop.f32.mrb[12].mxu0 }
 0x4b0   : > { %848 = vrot.lane.b32.xlu0 %v841_v38, %s1762_s20  ;;  %v1474_v39 = vpop.f32.mrb[13].mxu0  ;;  %s2153_s20 = sshll.u32 %s1852_s25, 7 }
 0x4b1   : > { %v844_v40 = vpop.f32.mrb[14].mxu0  ;;  %s2057_s17 = scalar_lea.hbm %s2147_s12, %s2153_s20 }
 0x4b2   : > { %v1475_v41 = vpop.f32.mrb[15].mxu0 }
 0x4b7   : > { %v958_v43 = vpop.f32.mrb[16].mxu0 }
 0x4b8   : > { %965 = vrot.lane.b32.xlu1 %v958_v43, %s1763_s28  ;;  %v1486_v44 = vpop.f32.mrb[17].mxu0 }
 0x4b9   : > { %v961_v45 = vpop.f32.mrb[18].mxu0 }
 0x4ba   : > { %v1487_v46 = vpop.f32.mrb[19].mxu0 }
 0x4fd   : > { %v732_v47 = vpop.permute.xlu1 %731 }
 0x4fe   : > { %735 = vst.msk [vmem:[#allocation2] sm:$0xff] %vm734_vm4, %v732_v47 }
 0x522   : > { %v849_v48 = vpop.permute.xlu0 %848 }
 0x523   : > { %852 = vst.msk [vmem:[#allocation2] sm:$0xff] %vm851_vm5, %v849_v48 }
 0x52a   : > { %v966_v49 = vpop.permute.xlu1 %965 }
 0x52b   : > { %969 = vst.msk [vmem:[#allocation2] sm:$0xff] %vm968_vm6, %v966_v49 }
 0x532   : > { %v972_v50 = vld [vmem:[#allocation2] sm:$0xff] }
 0x533   : > { %v973_v51 = vpack.c.bf16 %v972_v50, %v972_v50 }
 0x535   : > { %1493 = vmatmul.mubr.msk.bf16.vlgmr.msra.gmra.mrb[16].mxu1 %vm461_vm1, %v973_v51 }
 0x536   : > { %1512 = vmatprep.mubr.msk.bf16.mxu1 %vm1749_vm0, %v1748_v0  ;;  %1505 = vmatpush3.bf16.msra.mxu1 %v1595_v53 }
 0x537   : > { %1506 = vmatprep.subr.bf16.mxu1 %v1748_v0 }
 0x53a   : > { %1507 = vmatpush3.bf16.msra.mxu1 %v1596_v54 }
 0x53b   : > { %1508 = vmatprep.subr.bf16.mxu1 %v1748_v0 }
 0x53e   : > { %1509 = vmatpush3.bf16.msra.mxu1 %v1597_v62 }
 0x53f   : > { %1510 = vmatprep.subr.bf16.mxu1 %v1748_v0  ;;  %v1388_v0 = vld [vmem:[%s2143_s8] ss:$0 sm:$0xff] }
 0x542   : > { %1511 = vmatpush3.bf16.msra.mxu1 %v1598_v63 }
 0x608   : > { %v1034_v56 = vpop.f32.mrb[16].mxu1 }
 0x609   : > { %v1035_v57 = vadd.f32 %v1380_v55, %v1034_v56  ;;  %v1494_v58 = vpop.f32.mrb[17].mxu1 }
 0x60a   : > { %v1037_v59 = vpop.f32.mrb[18].mxu1 }
 0x60b   : > { %v1040_v60 = vpack.c.bf16 %v1035_v57, %v1035_v57  ;;  %v1495_v61 = vpop.f32.mrb[19].mxu1 }
 0x60d   : > { %1501 = vmatmul.mubr.msk.bf16.vlgmr.msra.gmra.mrb[20].mxu0 %vm461_vm1, %v1040_v60 }
 0x6e0   : > { %v1101_v2 = vpop.f32.mrb[20].mxu0 }
 0x6e1   : > { %v1102_v3 = vadd.f32 %v1384_v1, %v1101_v2  ;;  %v1502_v4 = vpop.f32.mrb[21].mxu0 }
 0x6e2   : > { %v1104_v5 = vpop.f32.mrb[22].mxu0 }
 0x6e3   : > { %v1107_v6 = vmax.f32 %v1102_v3, 0.0  ;;  %v1503_v7 = vpop.f32.mrb[23].mxu0 }
 0x6e5   : > { %v1108_v8 = vpack.c.bf16 %v1107_v6, %v1107_v6 }
 0x6e7   : > { %1513 = vmatmul.mubr.msk.bf16.vlgmr.msra.gmra.mrb[20].mxu1 %vm1148_vm7, %v1108_v8 }
 0x7ba   : > { %v1186_v9 = vpop.f32.mrb[20].mxu1 }
 0x7bb   : > { %v1187_v11 = vadd.f32 %v1388_v0, %v1186_v9  ;;  %v1514_v10 = vpop.f32.mrb[21].mxu1 }
 0x7bc   : > { %v1189_v12 = vpop.f32.mrb[22].mxu1 }
 0x7bd   : > { %v1515_v13 = vpop.f32.mrb[23].mxu1  ;;  %v1192_v14 = vadd.f32 %v1187_v11, %v1035_v57 }
 0x7bf   : > { %v1193_v15 = vsel %vm461_vm1, %v1192_v14, 0.0 }
 0x7c0   : > { %1194 = vadd.xlane.f32.xlu0 %v1193_v15 }
 0x84d   : > { %v1195_v16 = vpop.xlane.xlu0 %1194 }
 0x84e   : > { %v1197_v17 = vmul.f32 0.03125, %v1195_v16 }
 0x850   : > { %v1198_v18 = vsub.f32 %v1192_v14, %v1197_v17 }
 0x852   : > { %v1199_v19 = vmul.f32 %v1198_v18, %v1198_v18 }
 0x854   : > { %v1200_v20 = vsel %vm461_vm1, %v1199_v19, 0.0 }
 0x855   : > { %1201 = vadd.xlane.f32.xlu1 %v1200_v20 }
 0x856   : > { %1658 = shalt.err (!%p1655_p7)
}
 0x857   : > { %s1659_s15 = scalar_lea.hbm %s2057_s17, 128  ;;  %s1663_s19 = scalar_lea.hbm %s2147_s12, 256 }
 0x858   : > { %p1660_p8 = scmp.ne.s32.totalorder %s2057_s17, %s1659_s15  ;;  %p1664_p1 = scmp.lt.u32.totalorder %s2057_s17, %s2147_s12 }
 0x859   : > { %p1665_p0 = scmp.lt.u32.totalorder %s1663_s19, %s1659_s15  ;;  %p1667_p6 = scmp.lt.u32.totalorder %s1659_s15, %s2057_s17 }
 0x85a   : > { %p1661_p11 = pnand %p1660_p8, %p2165_p9 }
 0x85b   : > { %p1666_p5 = por %p1665_p0, %p1664_p1 }
 0x85c   : > { %p1662_p13 = pneg %p1661_p11 }
 0x85d   : > { %p1668_p10 = por %p1667_p6, %p1666_p5 }
 0x85f   : > { %p1669_p12 = pnand %p1668_p10, %p1662_p13 }
 0x861   : > { %1672 = shalt.err (!%p1669_p12)
}
 0x862   : > { %1521 = dma.vmem_to_hbm [thread:$0]  (%p2165_p9), %s1257_s18, 128, %s2057_s17, %s1230_s26   ;;  %v1394_v25 = vld [vmem:[%s2144_s9] ss:$0 sm:$0xff] }
 0x863   : > { %v1395_v27 = vld [vmem:[%s2145_s10] ss:$0 sm:$0xff]  ;;  %s2166_s28 = sshll.u32 %s1996_s23, 3  ;;  %s2167_s17 = sshll.u32 %s1852_s25, 7 }
 0x864   : > { %s423_s29 = scalar_lea.vmem [#allocation6], %s2166_s28  ;;  %s2091_s30 = scalar_lea.hbm %s2146_s11, %s2167_s17 }
 0x865   : > { %s1243_s19 = sshll.u32 %s423_s29, 4  ;;  %s1225_s0 = scalar_lea.sflag [#allocation5], %s1996_s23  ;;  %s2093_s19 = int_to_ptr.vmem [resolvable:$true] %s1243_s19 }
 0x866   : > { %s1673_s20 = scalar_lea.vmem %s2093_s19, 128  ;;  %s1765_s16 = smov [#allocation6]  }
 0x867   : > { %p1674_p2 = scmp.ne.s32.totalorder %s2093_s19, %s1673_s20  ;;  %s1677_s25 = sshll.u32 %s1765_s16, 4  ;;  %s1678_s25 = int_to_ptr.vmem [resolvable:$false] %s1677_s25 }
 0x868   : > { %s1679_s15 = scalar_lea.vmem %s1678_s25, 256  ;;  %p1680_p7 = scmp.lt.s32.totalorder %s2093_s19, %s1678_s25 }
 0x869   : > { %p1675_p3 = pnand %p1674_p2, %p2165_p9  ;;  %p1681_p8 = scmp.lt.s32.totalorder %s1679_s15, %s1673_s20 }
 0x86b   : > { %p1676_p4 = pneg %p1675_p3  ;;  %p1682_p11 = por %p1681_p8, %p1680_p7 }
 0x86d   : > { %p1683_p13 = pnand %p1682_p11, %p1676_p4 }
 0x8e2   : > { %v1202_v21 = vpop.xlane.xlu1 %1201 }
 0x8e3   : > { %v1203_v22 = vmul.f32 0.03125, %v1202_v21 }
 0x8e5   : > { %v1204_v23 = vadd.f32 1e-05, %v1203_v22 }
 0x8e7   : > { %1615 = vrsqrt.f32 %v1204_v23 }
 0x8f1   : > { %v1616_v24 = vpop.eup %1615 }
 0x8f2   : > { %v1206_v26 = vmul.f32 %v1616_v24, %v1198_v18 }
 0x8f4   : > { %v1214_v28 = vmul.f32 %v1394_v25, %v1206_v26 }
 0x8f6   : > { %v1222_v29 = vadd.f32 %v1395_v27, %v1214_v28 }
 0x8f8   : > { %1223 = vst.msk [vmem:[%s423_s29] sm:$0xff] %vm461_vm1, %v1222_v29 }
 0x8f9   : > { %1686 = shalt.err (!%p1683_p13)
}
 0x8fa   : > { %s1687_s23 = scalar_lea.hbm %s2091_s30, 128  ;;  %s1691_s17 = scalar_lea.hbm %s2146_s11, 256 }
 0x8fb   : > { %p1688_p1 = scmp.ne.s32.totalorder %s2091_s30, %s1687_s23  ;;  %p1692_p6 = scmp.lt.u32.totalorder %s2091_s30, %s2146_s11 }
 0x8fc   : > { %p1693_p10 = scmp.lt.u32.totalorder %s1691_s17, %s1687_s23  ;;  %p1695_p2 = scmp.lt.u32.totalorder %s1687_s23, %s2091_s30 }
 0x8fd   : > { %p1689_p0 = pnand %p1688_p1, %p2165_p9 }
 0x8fe   : > { %p1694_p12 = por %p1693_p10, %p1692_p6 }
 0x8ff   : > { %p1690_p5 = pneg %p1689_p0 }
 0x900   : > { %p1696_p3 = por %p1695_p2, %p1694_p12 }
 0x902   : > { %p1697_p4 = pnand %p1696_p3, %p1690_p5 }
 0x904   : > { %1700 = shalt.err (!%p1697_p4)
}
 0x905   : > { %1520 = dma.vmem_to_hbm [thread:$0]  (%p2165_p9), %s2093_s19, 128, %s2091_s30, %s1225_s0  }
 0x906 PF: > { %p1537_p7 = scmp.ge.s32.totalorder %s1743_s24, 2  ;;  %s1268_s20 = sand.u32 1, %s1731_s21  }
 0x907   : > { %p2168_p8 = scmp.ne.s32.totalorder %s2158_s14, 0  ;;  %s1269_s16 = scalar_lea.sflag [#allocation5], %s1268_s20 }
 0x909   : > { %p1529_p11 = pnand %p1537_p7, %p2168_p8 }
 0x90b   : > { %1722 = dma.done.wait (!%p1529_p11), %s1269_s16, 128  }
 0x90c   : > { %1724 = vsyncadd (!%p1529_p11), %s1269_s16, 4294967168  ;;  %s1278_s25 = scalar_lea.sflag [#allocation8], %s1268_s20 }
 0x90d   : > { %1726 = dma.done.wait (!%p1529_p11), %s1278_s25, 128  }
 0x90e   : > { %1728 = vsyncadd (!%p1529_p11), %s1278_s25, 4294967168  ;;  %s2169_s13 = sld [smem:[#allocation12_spill]]  ;;  %s2170_s23 = sld [smem:[#allocation13_spill]] }
 0x90f   : > { %p27_p9 = scmp.ge.s32.totalorder %s1856_s27, 4   ;;  %s2171_s21 = smov %s1735_s22 }
 0x910   : > { %s2173_s24 = smov %s1856_s27 }
 0x911   :  { %29 = sbr.rel (!%p27_p9) target bundleno = 8 (0x8), region = 121 }
 0x914   : > { %s2172_s22 = smov %s2169_s13 }
 0x918   :  { %1283 = vsyncpa [#allocation4], 1 }
 0x919   :  { %1285 = vsyncpa [#allocation4 + $0x1], 1 }
 0x91a   :  { %1286 = vsyncpa [#allocation5], 1 }
 0x91b   :  { %1288 = vsyncpa [#allocation5 + $0x1], 1 }
 0x91c   :  { %1289 = vsyncpa [#allocation8], 1 }
 0x91d   :  { %1291 = vsyncpa [#allocation8 + $0x1], 1 }

</bundles_post_ra>
